<compile_context>
chip_gen: v5e
topology: v5e:2x2
jax: 0.10.0
libtpu: 0.0.40
codegen_flags: <defaults>
</compile_context>

<pallas_src>
import jax
import jax.numpy as jnp
from jax import lax
from jax.experimental import pallas as pl
from jax.experimental.pallas import tpu as pltpu


def critic_kernel(obs_ref, act_ref,
                  w1o_ref, w1a_ref, b1_ref,
                  w2_ref, b2_ref,
                  w3_ref, b3_ref,
                  o_ref):
    """Inputs in native (tb, feat) f32; activations kept as (H, tb), batch on lanes."""
    # VPU cast of the raw f32 inputs to the MXU operand dtype (bf16).
    obs = obs_ref[...].astype(w1o_ref.dtype)     # (tb, S)
    act = act_ref[...].astype(w1a_ref.dtype)     # (tb, A)

    # Layer 1: h1 = relu(W1_obs @ obs^T + W1_act @ act^T + b1)   -> (H1, tb)
    # (torch.cat(..., dim=1) @ W1 expressed as two dots, one f32 accumulator;
    #  NT dot_general contracts the feature axis of both operands so no
    #  wrapper-side transpose is needed.)
    nt = (((1,), (1,)), ((), ()))
    h1 = lax.dot_general(w1o_ref[...], obs, nt, preferred_element_type=jnp.float32)
    h1 = h1 + lax.dot_general(w1a_ref[...], act, nt, preferred_element_type=jnp.float32)
    h1 = jnp.maximum(h1 + b1_ref[...], 0.0)       # f32 bias + ReLU

    # Layer 2: h2 = relu(W2^T @ h1 + b2)          -> (H2, tb)
    h2 = jnp.dot(w2_ref[...], h1.astype(w2_ref.dtype),
                 preferred_element_type=jnp.float32)
    h2 = jnp.maximum(h2 + b2_ref[...], 0.0)

    # Output layer (out_dim == 1): broadcast-mul + sublane reduce on VPU/XLU,
    # keeping the MXU free and avoiding an almost-all-padding matmul.
    q = jnp.sum(h2 * w3_ref[...], axis=0, keepdims=True) + b3_ref[...]
    o_ref[...] = q.astype(o_ref.dtype)            # (1, tb), lane-dense store


def _num_tensorcores():
    """Best-effort per-chip TensorCore count (v7x has 2, v5e/v6e have 1)."""
    try:
        kind = jax.devices()[0].device_kind.lower()
        if "v7" in kind:
            return 2
    except Exception:
        pass
    return 1


def critic_forward(obs, actions, kparams, *, batch_tile=4096):
    """obs: (B, state_dim) f32, actions: (B, action_dim) f32 -> (B, 1) f32."""
    B = obs.shape[0]
    w1o_t, w1a_t, b1, w2_t, b2, w3_c, b3 = kparams
    state_dim = w1o_t.shape[1]
    action_dim = w1a_t.shape[1]
    assert obs.shape == (B, state_dim) and actions.shape == (B, action_dim)

    # Tile the batch in 128-lane chunks.  Waste is < 128 lanes per tile (ragged
    # final blocks are masked by Pallas, no explicit jnp.pad / transpose / cast
    # passes in the wrapper).  Single-TC chips prefer one big tile; on v7x we
    # guarantee >= 2 tiles so the "parallel" axis uses both TensorCores.
    m = pl.cdiv(B, 128)                       # number of 128-lane batch chunks
    t_max = max(batch_tile // 128, 1)         # max chunks per tile
    n_tc = _num_tensorcores()
    n_tiles = min(m, max(pl.cdiv(m, t_max), n_tc))
    tb = 128 * pl.cdiv(m, n_tiles)            # lanes per tile (multiple of 128)

    def resident(a):  # whole-array block, same index every step -> stays in VMEM
        return pl.BlockSpec(a.shape, lambda i, _nd=a.ndim: (0,) * _nd)

    q = pl.pallas_call(
        critic_kernel,
        out_shape=jax.ShapeDtypeStruct((1, B), jnp.float32),
        grid=(n_tiles,),
        in_specs=[
            pl.BlockSpec((tb, state_dim), lambda i: (i, 0)),   # obs, native f32
            pl.BlockSpec((tb, action_dim), lambda i: (i, 0)),  # actions, native f32
            resident(w1o_t), resident(w1a_t), resident(b1),
            resident(w2_t), resident(b2),
            resident(w3_c), resident(b3),
        ],
        out_specs=pl.BlockSpec((1, tb), lambda i: (0, i)),
        compiler_params=pltpu.CompilerParams(
            dimension_semantics=("parallel",)),   # batch tiles across v7x's 2 TCs
    )(obs, actions, w1o_t, w1a_t, b1, w2_t, b2, w3_c, b3)

    return q.reshape(B, 1)  # (1, B) row-major == (B, 1) row-major; free reshape


def init_params(key, in_dim, net_arch):
    """Torch-layout (in, out) f32 params for qf1: Linear->ReLU->Linear->ReLU->Linear(1)."""
    dims = [in_dim] + list(net_arch) + [1]
    params = []
    for i in range(len(dims) - 1):
        key, wk = jax.random.split(key)
        w = jax.random.normal(wk, (dims[i], dims[i + 1]), jnp.float32) / jnp.sqrt(dims[i])
        b = jnp.zeros((dims[i + 1],), jnp.float32)
        params += [w, b]
    return tuple(params)


def prepare_params(params, state_dim, compute_dtype=jnp.bfloat16):
    """One-time conversion to the kernel layout:
       * split W1 rows into obs / action halves (removes the in-kernel concat),
       * transpose hidden weights to (out, in) so batch lives on the lane axis,
       * cast MXU operands to bf16 (accumulation stays f32); biases and the
         1-wide output weight stay f32 (VPU path)."""
    w1, b1, w2, b2, w3, b3 = params
    return (
        w1[:state_dim, :].T.astype(compute_dtype),   # (H1, state_dim)
        w1[state_dim:, :].T.astype(compute_dtype),   # (H1, action_dim)
        b1.reshape(-1, 1).astype(jnp.float32),       # (H1, 1)
        w2.T.astype(compute_dtype),                  # (H2, H1)
        b2.reshape(-1, 1).astype(jnp.float32),       # (H2, 1)
        w3.astype(jnp.float32),                      # (H2, 1)
        b3.reshape(1, 1).astype(jnp.float32),        # (1, 1)
    )


def _reference(obs, actions, params):
    """Pure-JAX reference of the same math (bf16 operands / f32 accumulate)."""
    w1, b1, w2, b2, w3, b3 = params
    bf = jnp.bfloat16
    x = jnp.concatenate([obs, actions], axis=1).astype(bf)
    r = jnp.maximum(jnp.dot(x, w1.astype(bf),
                            preferred_element_type=jnp.float32) + b1, 0.0)
    r = jnp.maximum(jnp.dot(r.astype(bf), w2.astype(bf),
                            preferred_element_type=jnp.float32) + b2, 0.0)
    return r @ w3 + b3


if __name__ == "__main__":
    # Small, module-consistent shapes.
    B = 8
    state_dim = 16      # features_dim (Flatten/identity feature extractor)
    action_dim = 4
    net_arch = [32, 32]

    key = jax.random.PRNGKey(0)
    k_obs, k_act, k_par = jax.random.split(key, 3)

    obs = jax.random.normal(k_obs, (B, state_dim), jnp.float32)
    actions = jax.random.normal(k_act, (B, action_dim), jnp.float32)

    params = init_params(k_par, state_dim + action_dim, net_arch)
    kparams = prepare_params(params, state_dim)

    q = critic_forward(obs, actions, kparams)
    jax.block_until_ready(q)
    ref = _reference(obs, actions, params)
    assert q.shape == (B, 1)
    assert jnp.allclose(q, ref, atol=1e-2, rtol=1e-2), float(jnp.max(jnp.abs(q - ref)))

    # Second case: ragged batch + multi-tile grid (exercises masked edge blocks).
    B2 = 300
    k_obs2, k_act2 = jax.random.split(jax.random.PRNGKey(1))
    obs2 = jax.random.normal(k_obs2, (B2, state_dim), jnp.float32)
    actions2 = jax.random.normal(k_act2, (B2, action_dim), jnp.float32)
    q2 = critic_forward(obs2, actions2, kparams, batch_tile=128)
    jax.block_until_ready(q2)
    ref2 = _reference(obs2, actions2, params)
    assert q2.shape == (B2, 1)
    assert jnp.allclose(q2, ref2, atol=1e-2, rtol=1e-2), float(jnp.max(jnp.abs(q2 - ref2)))

    # TODO(synk): feature_extractor is config-driven in the original module; a
    # Flatten/identity extractor (features_dim == state_dim) is assumed here,
    # and only the single qf1 head the spec builds is implemented (dropout=0).
    print("KERNEL_OK")
</pallas_src>

<mosaic_0001>
module attributes {stable_mosaic.version = 11 : i64} {
  func.func @critic_kernel(%arg0: i32, %arg1: memref<128x16xf32, #tpu.memory_space<vmem>>, %arg2: memref<128x4xf32, #tpu.memory_space<vmem>>, %arg3: memref<32x16xbf16, #tpu.memory_space<vmem>>, %arg4: memref<32x4xbf16, #tpu.memory_space<vmem>>, %arg5: memref<32x1xf32, #tpu.memory_space<vmem>>, %arg6: memref<32x32xbf16, #tpu.memory_space<vmem>>, %arg7: memref<32x1xf32, #tpu.memory_space<vmem>>, %arg8: memref<32x1xf32, #tpu.memory_space<vmem>>, %arg9: memref<1x1xf32, #tpu.memory_space<vmem>>, %arg10: memref<1x128xf32, #tpu.memory_space<vmem>>) attributes {dimension_semantics = [#tpu.dimension_semantics<parallel>], iteration_bounds = array<i64: 1>, scalar_prefetch = 0 : i64, scratch_operands = 0 : i64, tpu.core_type = #tpu.core_type<tc>, window_params = [{transform_indices = @transform_0, window_bounds = array<i64: 128, 16>}, {transform_indices = @transform_1, window_bounds = array<i64: 128, 4>}, {pipeline_mode = #tpu.pipeline_mode<synchronous>, transform_indices = @transform_2, window_bounds = array<i64: 32, 16>}, {pipeline_mode = #tpu.pipeline_mode<synchronous>, transform_indices = @transform_3, window_bounds = array<i64: 32, 4>}, {pipeline_mode = #tpu.pipeline_mode<synchronous>, transform_indices = @transform_4, window_bounds = array<i64: 32, 1>}, {pipeline_mode = #tpu.pipeline_mode<synchronous>, transform_indices = @transform_5, window_bounds = array<i64: 32, 32>}, {pipeline_mode = #tpu.pipeline_mode<synchronous>, transform_indices = @transform_6, window_bounds = array<i64: 32, 1>}, {pipeline_mode = #tpu.pipeline_mode<synchronous>, transform_indices = @transform_7, window_bounds = array<i64: 32, 1>}, {pipeline_mode = #tpu.pipeline_mode<synchronous>, transform_indices = @transform_8, window_bounds = array<i64: 1, 1>}, {transform_indices = @transform_9, window_bounds = array<i64: 1, 128>}]} {
    %c0 = arith.constant 0 : index
    %c0_0 = arith.constant 0 : index
    %0 = vector.load %arg1[%c0, %c0_0] : memref<128x16xf32, #tpu.memory_space<vmem>>, vector<128x16xf32>
    %1 = arith.truncf %0 : vector<128x16xf32> to vector<128x16xbf16>
    %c0_1 = arith.constant 0 : index
    %c0_2 = arith.constant 0 : index
    %2 = vector.load %arg2[%c0_1, %c0_2] : memref<128x4xf32, #tpu.memory_space<vmem>>, vector<128x4xf32>
    %3 = arith.truncf %2 : vector<128x4xf32> to vector<128x4xbf16>
    %c0_3 = arith.constant 0 : index
    %c0_4 = arith.constant 0 : index
    %4 = vector.load %arg3[%c0_3, %c0_4] : memref<32x16xbf16, #tpu.memory_space<vmem>>, vector<32x16xbf16>
    %cst = arith.constant dense<0.000000e+00> : vector<32x128xf32>
    %5 = tpu.matmul %4, %1, %cst {dimension_numbers = #tpu.dot_dimension_numbers<[1], [1], [0], [0], [0, 0, 1, 0], [], []>} : vector<32x16xbf16>, vector<128x16xbf16>, vector<32x128xf32> -> vector<32x128xf32>
    %c0_5 = arith.constant 0 : index
    %c0_6 = arith.constant 0 : index
    %6 = vector.load %arg4[%c0_5, %c0_6] : memref<32x4xbf16, #tpu.memory_space<vmem>>, vector<32x4xbf16>
    %cst_7 = arith.constant dense<0.000000e+00> : vector<32x128xf32>
    %7 = tpu.matmul %6, %3, %cst_7 {dimension_numbers = #tpu.dot_dimension_numbers<[1], [1], [0], [0], [0, 0, 1, 0], [], []>} : vector<32x4xbf16>, vector<128x4xbf16>, vector<32x128xf32> -> vector<32x128xf32>
    %8 = arith.addf %5, %7 : vector<32x128xf32>
    %c0_8 = arith.constant 0 : index
    %c0_9 = arith.constant 0 : index
    %9 = vector.load %arg5[%c0_8, %c0_9] : memref<32x1xf32, #tpu.memory_space<vmem>>, vector<32x1xf32>
    %10 = vector.broadcast %9 : vector<32x1xf32> to vector<32x128xf32>
    %11 = arith.addf %8, %10 : vector<32x128xf32>
    %cst_10 = arith.constant 0.000000e+00 : f32
    %12 = vector.broadcast %cst_10 : f32 to vector<32x128xf32>
    %13 = arith.maximumf %11, %12 : vector<32x128xf32>
    %c0_11 = arith.constant 0 : index
    %c0_12 = arith.constant 0 : index
    %14 = vector.load %arg6[%c0_11, %c0_12] : memref<32x32xbf16, #tpu.memory_space<vmem>>, vector<32x32xbf16>
    %15 = arith.truncf %13 : vector<32x128xf32> to vector<32x128xbf16>
    %cst_13 = arith.constant dense<0.000000e+00> : vector<32x128xf32>
    %16 = tpu.matmul %14, %15, %cst_13 {dimension_numbers = #tpu.dot_dimension_numbers<[1], [0], [0], [1], [0, 0, 1, 1], [], []>} : vector<32x32xbf16>, vector<32x128xbf16>, vector<32x128xf32> -> vector<32x128xf32>
    %c0_14 = arith.constant 0 : index
    %c0_15 = arith.constant 0 : index
    %17 = vector.load %arg7[%c0_14, %c0_15] : memref<32x1xf32, #tpu.memory_space<vmem>>, vector<32x1xf32>
    %18 = vector.broadcast %17 : vector<32x1xf32> to vector<32x128xf32>
    %19 = arith.addf %16, %18 : vector<32x128xf32>
    %cst_16 = arith.constant 0.000000e+00 : f32
    %20 = vector.broadcast %cst_16 : f32 to vector<32x128xf32>
    %21 = arith.maximumf %19, %20 : vector<32x128xf32>
    %c0_17 = arith.constant 0 : index
    %c0_18 = arith.constant 0 : index
    %22 = vector.load %arg8[%c0_17, %c0_18] : memref<32x1xf32, #tpu.memory_space<vmem>>, vector<32x1xf32>
    %23 = vector.broadcast %22 : vector<32x1xf32> to vector<32x128xf32>
    %24 = arith.mulf %21, %23 : vector<32x128xf32>
    %cst_19 = arith.constant dense<0.000000e+00> : vector<128xf32>
    %25 = vector.multi_reduction <add>, %24, %cst_19 [0] : vector<32x128xf32> to vector<128xf32>
    %26 = vector.shape_cast %25 : vector<128xf32> to vector<1x128xf32>
    %c0_20 = arith.constant 0 : index
    %c0_21 = arith.constant 0 : index
    %27 = vector.load %arg9[%c0_20, %c0_21] : memref<1x1xf32, #tpu.memory_space<vmem>>, vector<1x1xf32>
    %28 = vector.broadcast %27 : vector<1x1xf32> to vector<1x128xf32>
    %29 = arith.addf %26, %28 : vector<1x128xf32>
    %c0_22 = arith.constant 0 : index
    %c0_23 = arith.constant 0 : index
    %30 = vector.load %arg10[%c0_22, %c0_23] : memref<1x128xf32, #tpu.memory_space<vmem>>, vector<1x128xf32>
    tpu.vector_store %arg10[%c0_22, %c0_23], %29 {strides = array<i32>} : memref<1x128xf32, #tpu.memory_space<vmem>>, vector<1x128xf32>,
    return
  }
  func.func @transform_0(%arg0: i32) -> (i32, i32) {
    %c0_i32 = arith.constant 0 : i32
    %c0_i32_0 = arith.constant 0 : i32
    return %arg0, %c0_i32 : i32, i32
  }
  func.func @transform_1(%arg0: i32) -> (i32, i32) {
    %c0_i32 = arith.constant 0 : i32
    %c0_i32_0 = arith.constant 0 : i32
    return %arg0, %c0_i32 : i32, i32
  }
  func.func @transform_2(%arg0: i32) -> (i32, i32) {
    %c0_i32 = arith.constant 0 : i32
    %c0_i32_0 = arith.constant 0 : i32
    %c0_i32_1 = arith.constant 0 : i32
    return %c0_i32, %c0_i32_0 : i32, i32
  }
  func.func @transform_3(%arg0: i32) -> (i32, i32) {
    %c0_i32 = arith.constant 0 : i32
    %c0_i32_0 = arith.constant 0 : i32
    %c0_i32_1 = arith.constant 0 : i32
    return %c0_i32, %c0_i32_0 : i32, i32
  }
  func.func @transform_4(%arg0: i32) -> (i32, i32) {
    %c0_i32 = arith.constant 0 : i32
    %c0_i32_0 = arith.constant 0 : i32
    %c0_i32_1 = arith.constant 0 : i32
    return %c0_i32, %c0_i32_0 : i32, i32
  }
  func.func @transform_5(%arg0: i32) -> (i32, i32) {
    %c0_i32 = arith.constant 0 : i32
    %c0_i32_0 = arith.constant 0 : i32
    %c0_i32_1 = arith.constant 0 : i32
    return %c0_i32, %c0_i32_0 : i32, i32
  }
  func.func @transform_6(%arg0: i32) -> (i32, i32) {
    %c0_i32 = arith.constant 0 : i32
    %c0_i32_0 = arith.constant 0 : i32
    %c0_i32_1 = arith.constant 0 : i32
    return %c0_i32, %c0_i32_0 : i32, i32
  }
  func.func @transform_7(%arg0: i32) -> (i32, i32) {
    %c0_i32 = arith.constant 0 : i32
    %c0_i32_0 = arith.constant 0 : i32
    %c0_i32_1 = arith.constant 0 : i32
    return %c0_i32, %c0_i32_0 : i32, i32
  }
  func.func @transform_8(%arg0: i32) -> (i32, i32) {
    %c0_i32 = arith.constant 0 : i32
    %c0_i32_0 = arith.constant 0 : i32
    %c0_i32_1 = arith.constant 0 : i32
    return %c0_i32, %c0_i32_0 : i32, i32
  }
  func.func @transform_9(%arg0: i32) -> (i32, i32) {
    %c0_i32 = arith.constant 0 : i32
    %c0_i32_0 = arith.constant 0 : i32
    return %c0_i32, %arg0 : i32, i32
  }
}

</mosaic_0001>

<bundles_post_ra>
// kernel: tpu_custom_call.1
= control target key start
LH: loop header
LB: loop body
LE: loop exit
PB: predicated region body
PF: predicated region fallthrough
CT: control target
= control target key end

     0   :  { %s679_s0 = inlined_call_operand.vmem [shape: f32[8,16], index: 0, kind: input, shape index: {}]   ;;  %s680_s1 = inlined_call_operand.vmem [shape: f32[8,4], index: 1, kind: input, shape index: {}]   ;;  %s681_s2 = inlined_call_operand.vmem [shape: bf16[32,16], index: 2, kind: input, shape index: {}]   ;;  %s682_s3 = inlined_call_operand.vmem [shape: bf16[32,4], index: 3, kind: input, shape index: {}]   ;;  %s683_s4 = inlined_call_operand.vmem [shape: f32[32,1], index: 4, kind: input, shape index: {}]   ;;  %s684_s5 = inlined_call_operand.vmem [shape: bf16[32,32], index: 5, kind: input, shape index: {}]   ;;  %s685_s6 = inlined_call_operand.vmem [shape: f32[32,1], index: 6, kind: input, shape index: {}]   ;;  %s686_s7 = inlined_call_operand.vmem [shape: f32[32,1], index: 7, kind: input, shape index: {}]   ;;  %s687_s8 = inlined_call_operand.<no memory space> [shape: f32[1,1], index: 8, kind: input, shape index: {}]   ;;  %s688_s9 = inlined_call_operand.hbm [shape: f32[1,8], index: 9, kind: output, shape index: {}]  }
   0x1   :  { %v14_v0 = vstv %s687_s8 }
   0x2   :  { %15 = vst [vmem:[#allocation2] sm:$0x1] %v14_v0 }
   0x3   :  { %v74_v1 = vld [vmem:[%s680_s1 + $0x70] sm:$0xff]  ;;  %v75_v2 = vld [vmem:[%s680_s1 + $0x78] sm:$0xff]  ;;  %vm102_vm0 = vcmask 31744   ;;  %vm162_vm1 = vcmask 130048   ;;  %v72_v7 = vld [vmem:[%s680_s1 + $0x60] sm:$0xff] }
   0x4   :  { %v50_v3 = vld [vmem:[%s679_s0 + $0x70] sm:$0xff]  ;;  %v83_v4 = vpack.c.bf16 %v75_v2, %v74_v1  ;;  %v51_v5 = vld [vmem:[%s679_s0 + $0x78] sm:$0xff]  ;;  %v73_v8 = vld [vmem:[%s680_s1 + $0x68] sm:$0xff] }
   0x5   :  { %v59_v6 = vpack.c.bf16 %v51_v5, %v50_v3  ;;  %v48_v10 = vld [vmem:[%s679_s0 + $0x60] sm:$0xff]  ;;  %v49_v11 = vld [vmem:[%s679_s0 + $0x68] sm:$0xff]  ;;  %v82_v13 = vpack.c.bf16 %v73_v8, %v72_v7 }
   0x6   :  { %v131_v9 = vsel %vm102_vm0, %v83_v4, 0  ;;  %v58_v14 = vpack.c.bf16 %v49_v11, %v48_v10 }
   0x7   :  { %133 = vmatpush.bf16.xpose.msra.mxu0 %v131_v9  ;;  %v191_v12 = vsel %vm162_vm1, %v59_v6, 0  ;;  %412 = vmatpush.bf16.xpose.msra.mxu3 %v131_v9 }
   0x8   :  { %193 = vmatpush.bf16.xpose.msra.mxu1 %v191_v12 }
   0x9   :  { %16 = vsyncpa [#allocation4], 0  ;;  %v128_v15 = vsel %vm102_vm0, %v82_v13, 0  ;;  %v188_v16 = vsel %vm162_vm1, %v58_v14, 0  ;;  %v70_v17 = vld [vmem:[%s680_s1 + $0x50] sm:$0xff]  ;;  %v71_v18 = vld [vmem:[%s680_s1 + $0x58] sm:$0xff] }
   0xa   :  { %v46_v19 = vld [vmem:[%s679_s0 + $0x50] sm:$0xff]  ;;  %v47_v20 = vld [vmem:[%s679_s0 + $0x58] sm:$0xff]  ;;  %v81_v21 = vpack.c.bf16 %v71_v18, %v70_v17  ;;  %v68_v25 = vld [vmem:[%s680_s1 + $0x40] sm:$0xff]  ;;  %v451_v40 = vmov 0   ;;  %vm284_vm2 = vcmask 261120   ;;  %s367_s8 = sshll.u32 %s688_s9, 4  ;;  %s368_s8 = int_to_ptr.hbm [resolvable:$true] %s367_s8 }
   0xb   :  { %v57_v22 = vpack.c.bf16 %v47_v20, %v46_v19  ;;  %v69_v26 = vld [vmem:[%s680_s1 + $0x48] sm:$0xff]  ;;  %v44_v27 = vld [vmem:[%s679_s0 + $0x40] sm:$0xff]  ;;  %v66_v33 = vld [vmem:[%s680_s1 + $0x30] sm:$0xff]  ;;  %422 = vset.pattern.permute.xlu0 %v451_v40  ;;  %423 = vset.pattern.permute.xlu1 %v451_v40 }
   0xc   :  { %v125_v23 = vsel %vm102_vm0, %v81_v21, 0  ;;  %v45_v28 = vld [vmem:[%s679_s0 + $0x48] sm:$0xff]  ;;  %v80_v29 = vpack.c.bf16 %v69_v26, %v68_v25  ;;  %v67_v34 = vld [vmem:[%s680_s1 + $0x38] sm:$0xff]  ;;  %v42_v35 = vld [vmem:[%s679_s0 + $0x30] sm:$0xff]  ;;  %424 = vset.pattern.permute.xlu2 %v451_v40 }
   0xd   :  { %v185_v24 = vsel %vm162_vm1, %v57_v22, 0  ;;  %v56_v30 = vpack.c.bf16 %v45_v28, %v44_v27  ;;  %v43_v36 = vld [vmem:[%s679_s0 + $0x38] sm:$0xff]  ;;  %v79_v37 = vpack.c.bf16 %v67_v34, %v66_v33  ;;  %v214_v38 = vld [vmem:[%s683_s4 + $0x10] sm:$0xff]  ;;  %v64_v43 = vld [vmem:[%s680_s1 + $0x20] sm:$0xff] }
   0xe   :  { %v122_v31 = vsel %vm102_vm0, %v80_v29, 0  ;;  %v55_v39 = vpack.c.bf16 %v43_v36, %v42_v35  ;;  %228 = vperm.xlu0 %422, %v214_v38   ;;  %v65_v44 = vld [vmem:[%s680_s1 + $0x28] sm:$0xff]  ;;  %v40_v45 = vld [vmem:[%s679_s0 + $0x20] sm:$0xff]  ;;  %v215_v47 = vld [vmem:[%s683_s4 + $0x18] sm:$0xff] }
   0xf   :  { %134 = vmatpush.bf16.xpose.msra.mxu0 %v128_v15  ;;  %413 = vmatpush.bf16.xpose.msra.mxu3 %v128_v15  ;;  %v182_v32 = vsel %vm162_vm1, %v56_v30, 0  ;;  %v119_v41 = vsel %vm102_vm0, %v79_v37, 0  ;;  %v41_v46 = vld [vmem:[%s679_s0 + $0x28] sm:$0xff]  ;;  %v212_v48 = vld [vmem:[%s683_s4] sm:$0xff]  ;;  %v78_v49 = vpack.c.bf16 %v65_v44, %v64_v43  ;;  %v62_v53 = vld [vmem:[%s680_s1 + $0x10] sm:$0xff] }
  0x10   :  { %194 = vmatpush.bf16.xpose.msra.mxu1 %v188_v16  ;;  %v179_v42 = vsel %vm162_vm1, %v55_v39, 0  ;;  %218 = vperm.xlu1 %423, %v212_v48   ;;  %v54_v50 = vpack.c.bf16 %v41_v46, %v40_v45  ;;  %v63_v54 = vld [vmem:[%s680_s1 + $0x18] sm:$0xff]  ;;  %v38_v55 = vld [vmem:[%s679_s0 + $0x10] sm:$0xff]  ;;  %v60_v62 = vld [vmem:[%s680_s1] sm:$0xff] }
  0x11   :  { %v116_v51 = vsel %vm102_vm0, %v78_v49, 0  ;;  %v39_v56 = vld [vmem:[%s679_s0 + $0x18] sm:$0xff]  ;;  %v252_v57 = vld [vmem:[%s685_s6 + $0x10] sm:$0xff]  ;;  %v77_v58 = vpack.c.bf16 %v63_v54, %v62_v53  ;;  %v61_v63 = vld [vmem:[%s680_s1 + $0x8] sm:$0xff] }
  0x12   :  { %v176_v52 = vsel %vm162_vm1, %v54_v50, 0  ;;  %v53_v59 = vpack.c.bf16 %v39_v56, %v38_v55  ;;  %v36_v0 = vld [vmem:[%s679_s0] sm:$0xff]  ;;  %v37_v1 = vld [vmem:[%s679_s0 + $0x8] sm:$0xff]  ;;  %v76_v4 = vpack.c.bf16 %v61_v63, %v60_v62  ;;  %v253_v8 = vld [vmem:[%s685_s6 + $0x18] sm:$0xff] }
  0x13   :  { %v113_v60 = vsel %vm102_vm0, %v77_v58, 0  ;;  %v213_v2 = vld [vmem:[%s683_s4 + $0x8] sm:$0xff]  ;;  %v52_v5 = vpack.c.bf16 %v37_v1, %v36_v0  ;;  %v351_v9 = vld [vmem:[#allocation2] sm:$0x1]  ;;  %v316_v13 = vld [vmem:[%s686_s7 + $0x10] sm:$0xff] }
  0x14   :  { %v173_v61 = vsel %vm162_vm1, %v53_v59, 0  ;;  %v315_v3 = vld [vmem:[%s686_s7 + $0x8] sm:$0xff]  ;;  %v110_v6 = vsel %vm102_vm0, %v76_v4, 0  ;;  %v408_v10 = vld [vmem:[%s682_s3] sm:$0xff]  ;;  %v317_v45 = vld [vmem:[%s686_s7 + $0x18] sm:$0xff] }
  0x15   :  { %v170_v7 = vsel %vm162_vm1, %v52_v5, 0  ;;  %v409_v11 = vld [vmem:[%s682_s3 + $0x8] sm:$0xff]  ;;  %v406_v12 = vld [vmem:[%s681_s2] sm:$0xff] }
  0x16   :  { %233 = vperm.xlu0 %422, %v215_v47   ;;  %v407_v14 = vld [vmem:[%s681_s2 + $0x8] sm:$0xff]  ;;  %v250_v27 = vld [vmem:[%s685_s6] sm:$0xff] }
  0x17   :  { %135 = vmatpush.bf16.xpose.msra.mxu0 %v125_v23  ;;  %414 = vmatpush.bf16.xpose.msra.mxu3 %v125_v23  ;;  %v251_v38 = vld [vmem:[%s685_s6 + $0x8] sm:$0xff]  ;;  %v410_v43 = vld [vmem:[%s684_s5] sm:$0xff] }
  0x18   :  { %195 = vmatpush.bf16.xpose.msra.mxu1 %v185_v24  ;;  %223 = vperm.xlu1 %423, %v213_v2   ;;  %v314_v44 = vld [vmem:[%s686_s7] sm:$0xff]  ;;  %v411_v46 = vld [vmem:[%s684_s5 + $0x8] sm:$0xff]  ;;  %s452_s5 = smov [#allocation3]  }
  0x19   :  { %256 = vperm.xlu2 %424, %v250_v27   ;;  %s365_s7 = sshll.u32 %s452_s5, 4  ;;  %s366_s7 = int_to_ptr.vmem [resolvable:$true] %s365_s7 }
  0x1e   :  { %266 = vperm.xlu0 %422, %v252_v57  }
  0x1f   :  { %136 = vmatpush.bf16.xpose.msra.mxu0 %v122_v31  ;;  %415 = vmatpush.bf16.xpose.msra.mxu3 %v122_v31 }
  0x20   :  { %196 = vmatpush.bf16.xpose.msra.mxu1 %v182_v32  ;;  %271 = vperm.xlu1 %423, %v253_v8  }
  0x21   :  { %261 = vperm.xlu2 %424, %v251_v38  }
  0x26   :  { %325 = vperm.xlu0 %422, %v315_v3  }
  0x27   :  { %137 = vmatpush.bf16.xpose.msra.mxu0 %v119_v41  ;;  %416 = vmatpush.bf16.xpose.msra.mxu3 %v119_v41 }
  0x28   :  { %197 = vmatpush.bf16.xpose.msra.mxu1 %v179_v42  ;;  %330 = vperm.xlu1 %423, %v316_v13  }
  0x29   :  { %320 = vperm.xlu2 %424, %v314_v44  }
  0x2e   :  { %354 = vperm.xlu0 %422, %v351_v9  }
  0x2f   :  { %138 = vmatpush.bf16.xpose.msra.mxu0 %v116_v51  ;;  %417 = vmatpush.bf16.xpose.msra.mxu3 %v116_v51 }
  0x30   :  { %198 = vmatpush.bf16.xpose.msra.mxu1 %v176_v52 }
  0x31   :  { %335 = vperm.xlu2 %424, %v317_v45  }
  0x37   :  { %139 = vmatpush.bf16.xpose.msra.mxu0 %v113_v60  ;;  %418 = vmatpush.bf16.xpose.msra.mxu3 %v113_v60 }
  0x38   :  { %199 = vmatpush.bf16.xpose.msra.mxu1 %v173_v61 }
  0x3f   :  { %140 = vmatpush.bf16.xpose.msra.mxu0 %v110_v6  ;;  %419 = vmatpush.bf16.xpose.msra.mxu3 %v110_v6 }
  0x40   :  { %200 = vmatpush.bf16.xpose.msra.mxu1 %v170_v7 }
  0x46   :  { %384 = vmatmul.msk.bf16.vlgmr.msra.gmra.mxu0 %vm102_vm0, %v408_v10  ;;  %385 = vmatmul.msk.bf16.vlgmr.msra.gmra.mxu3 %vm102_vm0, %v409_v11 }
  0x47   :  { %394 = vmatmul.msk.bf16.vlgmr.msra.gmra.mxu1 %vm162_vm1, %v406_v12 }
  0x57   :  { %395 = vmatmul.msk.bf16.gmra.mxu1 %vm162_vm1, %v407_v14 }
  0x73   :  { %v257_v47 = vpop.permute.xlu2 %256 }
  0x7b   :  { %v262_v49 = vpop.permute.xlu2 %261 }
  0x80   :  { %v229_v19 = vpop.permute.xlu0 %228 }
  0x82   :  { %v219_v20 = vpop.permute.xlu1 %218 }
  0x83   :  { %v321_v57 = vpop.permute.xlu2 %320 }
  0x88   :  { %v234_v31 = vpop.permute.xlu0 %233 }
  0x8a   :  { %v224_v32 = vpop.permute.xlu1 %223 }
  0x8b   :  { %v336_v6 = vpop.permute.xlu2 %335 }
  0x90   :  { %v267_v51 = vpop.permute.xlu0 %266 }
  0x92   :  { %v272_v52 = vpop.permute.xlu1 %271 }
  0x98   :  { %v326_v61 = vpop.permute.xlu0 %325 }
  0x9a   :  { %v331_v63 = vpop.permute.xlu1 %330 }
  0xa0   :  { %v355_v14 = vpop.permute.xlu0 %354 }
  0xc3   :  { %v142_v17 = vpop.f32.mrf.mxu0 }
  0xc4   :  { %v202_v15 = vpop.f32.mrf.mxu1 }
  0xc5   :  { %v203_v28 = vadd.f32 %v202_v15, %v142_v17 }
  0xc7   :  { %v236_v35 = vadd.f32 %v219_v20, %v203_v28 }
  0xc9   :  { %v147_v18 = vpop.f32.mrf.mxu3  ;;  %v240_v41 = vmax.f32 %v236_v35, 0.0 }
  0xcb   :  { %v144_v22 = vpop.f32.mrf.mxu0 }
  0xcc   :  { %v204_v16 = vpop.f32.mrf.mxu1 }
  0xcd   :  { %v205_v24 = vadd.f32 %v204_v16, %v144_v22  ;;  %v357_v16 = vperm.slane %v355_v14, 0 }
  0xcf   :  { %v237_v33 = vadd.f32 %v224_v32, %v205_v24 }
  0xd1   :  { %v149_v25 = vpop.f32.mrf.mxu3  ;;  %v241_v39 = vmax.f32 %v237_v33, 0.0 }
  0xd3   :  { %v248_v42 = vpack.c.bf16 %v241_v39, %v240_v41 }
  0xd4   :  { %v207_v21 = vpop.f32.mrf.mxu1 }
  0xd5   :  { %v208_v23 = vadd.f32 %v207_v21, %v147_v18 }
  0xd7   :  { %v238_v30 = vadd.f32 %v229_v19, %v208_v23 }
  0xd9   :  { %v242_v36 = vmax.f32 %v238_v30, 0.0 }
  0xdc   :  { %v209_v26 = vpop.f32.mrf.mxu1 }
  0xdd   :  { %v210_v29 = vadd.f32 %v209_v26, %v149_v25 }
  0xdf   :  { %v239_v34 = vadd.f32 %v234_v31, %v210_v29 }
  0xe1   :  { %v243_v37 = vmax.f32 %v239_v34, 0.0 }
  0xe3   :  { %v249_v40 = vpack.c.bf16 %v243_v37, %v242_v36 }
  0xe5   :  { %297 = vmatpush.bf16.msra.mxu2 %v249_v40 }
  0xe9   :  { %298 = vmatpush.bf16.msra.mxu2 %v248_v42 }
  0xec   :  { %404 = vmatmul.msk.bf16.vlgmr.msra.gmra.mxu2 %vm284_vm2, %v410_v43 }
  0xfc   :  { %405 = vmatmul.msk.bf16.gmra.mxu2 %vm284_vm2, %v411_v46 }
 0x16f   :  { %v300_v48 = vpop.f32.mrf.mxu2 }
 0x170   :  { %v301_v55 = vadd.f32 %v300_v48, %v257_v47 }
 0x172   :  { %v310_v59 = vmax.f32 %v301_v55, 0.0 }
 0x174   :  { %v338_v1 = vmul.f32 %v321_v57, %v310_v59 }
 0x177   :  { %v302_v50 = vpop.f32.mrf.mxu2 }
 0x178   :  { %v303_v53 = vadd.f32 %v302_v50, %v262_v49 }
 0x17a   :  { %v311_v58 = vmax.f32 %v303_v53, 0.0 }
 0x17c   :  { %v339_v62 = vmul.f32 %v326_v61, %v311_v58 }
 0x17e   :  { %v342_v4 = vadd.f32 %v339_v62, %v338_v1 }
 0x17f   :  { %v305_v54 = vpop.f32.mrf.mxu2 }
 0x180   :  { %v306_v56 = vadd.f32 %v305_v54, %v267_v51 }
 0x182   :  { %v312_v60 = vmax.f32 %v306_v56, 0.0 }
 0x184   :  { %v340_v2 = vmul.f32 %v331_v63, %v312_v60 }
 0x186   :  { %v343_v7 = vadd.f32 %v342_v4, %v340_v2 }
 0x187   :  { %v307_v0 = vpop.f32.mrf.mxu2 }
 0x188   :  { %v308_v3 = vadd.f32 %v307_v0, %v272_v52 }
 0x18a   :  { %v313_v5 = vmax.f32 %v308_v3, 0.0 }
 0x18c   :  { %v341_v8 = vmul.f32 %v336_v6, %v313_v5 }
 0x18e   :  { %v344_v9 = vadd.f32 %v343_v7, %v341_v8 }
 0x190   :  { %v345_v10 = vrot.slane %v344_v9, 4 }
 0x192   :  { %v346_v11 = vadd.f32 %v345_v10, %v344_v9 }
 0x194   :  { %v347_v12 = vrot.slane %v346_v11, 2 }
 0x196   :  { %v348_v13 = vadd.f32 %v347_v12, %v346_v11 }
 0x198   :  { %v349_v15 = vrot.slane %v348_v13, 1 }
 0x19a   :  { %v350_v17 = vadd.f32 %v349_v15, %v348_v13 }
 0x19c   :  { %v358_v18 = vadd.f32 %v357_v16, %v350_v17 }
 0x19e   :  { %359 = vst [vmem:[#allocation3] sm:$0x1] %v358_v18 }
 0x19f   :  { %370 = dma.vmem_to_hbm [thread:$0]  %s366_s7, 16, %s368_s8, [#allocation4]  }
 0x1a0   :  { %449 = dma.done.wait [#allocation4], 16  }
 0x1a1   :  { %450 = vsyncadd [#allocation4], 4294967280 }
 0x1a2   :  { %375 = vsyncpa [#allocation4], 1 }

</bundles_post_ra>
